<compile_context>
chip_gen: v7x
topology: tpu7x:2x2x1
jax: 0.10.0
libtpu: 0.0.40
codegen_flags: <defaults>
</compile_context>

<pallas_src>
import functools

import jax
import jax.numpy as jnp
from jax import lax
from jax.experimental import pallas as pl
from jax.experimental.pallas import tpu as pltpu

_BN_EPS = 1e-5
_VMEM_LIMIT = 32 * 1024 * 1024   # conservative: fits v5e/v6e/v7x scoped VMEM


# ------------------------------ Pallas kernels ------------------------------
def _conv_stats_kernel(x_ref, w_ref, out_ref, sum_ref, sumsq_ref, *, kh, h):
    """Pass 1: 3x3 conv of one image as `kh` banded matmuls + BN-stat accum.

    x_ref   : (H+2p, (W+2p)*Cin)        bf16  padded, lane-folded image
    w_ref   : (kh, (W+2p)*Cin, W*Cout)  bf16  banded weights (KW taps folded)
    out_ref : (H, W*Cout)               f32   raw conv output (lane dense)
    sum_ref / sumsq_ref : (1, W*Cout)   f32   accumulated over the batch grid
    """
    x = x_ref[...]
    acc = jnp.zeros(out_ref.shape, jnp.float32)
    for dh in range(kh):                                   # static, unrolled
        acc = acc + jnp.dot(x[dh:dh + h, :], w_ref[dh],
                            preferred_element_type=jnp.float32)
    out_ref[...] = acc

    @pl.when(pl.program_id(0) == 0)
    def _():
        sum_ref[...] = jnp.zeros_like(sum_ref)
        sumsq_ref[...] = jnp.zeros_like(sumsq_ref)

    sum_ref[...] += jnp.sum(acc, axis=0, keepdims=True)
    sumsq_ref[...] += jnp.sum(acc * acc, axis=0, keepdims=True)


def _bn_act_kernel(y_ref, scale_ref, shift_ref, out_ref):
    """Pass 2: fused BN (single scale/shift) + ReLU."""
    y = y_ref[...] * scale_ref[...] + shift_ref[...]
    out_ref[...] = jnp.maximum(y, 0.0).astype(out_ref.dtype)


def _bn_act_res_kernel(y_ref, scale_ref, shift_ref, res_ref, out_ref):
    """Pass 2 (final block): fused BN + ReLU + residual add."""
    y = jnp.maximum(y_ref[...] * scale_ref[...] + shift_ref[...], 0.0)
    out_ref[...] = (y + res_ref[...]).astype(out_ref.dtype)


# --------------------------------- glue -------------------------------------
def _banded_weights(w_hwio, width):
    """Fold the KW taps of each kernel row into ((W+KW-1)*Cin, W*Cout) bands."""
    kh, kw, cin, cout = w_hwio.shape
    wp = jnp.arange(width + kw - 1)[:, None]      # padded-input column
    wo = jnp.arange(width)[None, :]               # output column
    dw = wp - wo
    valid = (dw >= 0) & (dw < kw)
    g = w_hwio[:, jnp.clip(dw, 0, kw - 1)]        # (kh, W+kw-1, W, Cin, Cout)
    g = jnp.where(valid[None, :, :, None, None], g, 0.0)
    g = jnp.transpose(g, (0, 1, 3, 2, 4))         # (kh, W+kw-1, Cin, W, Cout)
    return g.reshape(kh, (width + kw - 1) * cin, width * cout)


def _pad_fold(x_nhwc, pad):
    """(N,H,W,C) -> zero-padded, lane-folded slab (N, H+2p, (W+2p)*C)."""
    n, h, w, c = x_nhwc.shape
    xp = jnp.pad(x_nhwc, ((0, 0), (pad, pad), (pad, pad), (0, 0)))
    return xp.reshape(n, h + 2 * pad, (w + 2 * pad) * c)


def _conv_bn_act_block(x_nhwc, w_hwio, gamma, beta, residual=None,
                       out_dtype=jnp.float32):
    """One Conv(3x3, pad=1) + BN(train) + ReLU (+ optional residual).

    Returns the result in lane-folded layout (N, H, W*Cout).
    """
    n, h, w, cin = x_nhwc.shape
    kh, kw, _, cout = w_hwio.shape
    pad = (kw - 1) // 2                            # 'same' conv (padding=1)

    slab = _pad_fold(x_nhwc, pad).astype(jnp.bfloat16)        # (N,H+2,(W+2)*Cin)
    wband = _banded_weights(w_hwio, w).astype(jnp.bfloat16)   # (KH,(W+2)*Cin,W*Cout)

    hp, kp = h + 2 * pad, (w + 2 * pad) * cin
    wc = w * cout

    # -- pass 1: conv + batch-stat accumulation (grid over N, "arbitrary") ----
    conv_out, lane_sum, lane_sumsq = pl.pallas_call(
        functools.partial(_conv_stats_kernel, kh=kh, h=h),
        grid=(n,),
        out_shape=(jax.ShapeDtypeStruct((n, h, wc), jnp.float32),
                   jax.ShapeDtypeStruct((1, wc), jnp.float32),
                   jax.ShapeDtypeStruct((1, wc), jnp.float32)),
        in_specs=[pl.BlockSpec((None, hp, kp), lambda i: (i, 0, 0)),
                  pl.BlockSpec((kh, kp, wc), lambda i: (0, 0, 0))],
        out_specs=(pl.BlockSpec((None, h, wc), lambda i: (i, 0, 0)),
                   pl.BlockSpec((1, wc), lambda i: (0, 0)),
                   pl.BlockSpec((1, wc), lambda i: (0, 0))),
        compiler_params=pltpu.CompilerParams(
            dimension_semantics=("arbitrary",),
            vmem_limit_bytes=_VMEM_LIMIT),
    )(slab, wband)

    # -- BN finalize (tiny O(C) math): fold into one scale/shift per channel --
    cnt = n * h * w
    mean = lane_sum.reshape(w, cout).sum(axis=0) / cnt
    var = jnp.maximum(lane_sumsq.reshape(w, cout).sum(axis=0) / cnt
                      - mean * mean, 0.0)                     # biased (train BN)
    scale_c = gamma * lax.rsqrt(var + _BN_EPS)
    shift_c = beta - mean * scale_c
    scale = jnp.tile(scale_c, w).reshape(1, wc)               # lane layout (w, co)
    shift = jnp.tile(shift_c, w).reshape(1, wc)

    # -- pass 2: scale/shift + ReLU (+ residual), grid over N, "parallel" -----
    row_spec = pl.BlockSpec((None, h, wc), lambda i: (i, 0, 0))
    vec_spec = pl.BlockSpec((1, wc), lambda i: (0, 0))
    if residual is None:
        kernel, operands = _bn_act_kernel, (conv_out, scale, shift)
        in_specs = [row_spec, vec_spec, vec_spec]
    else:
        kernel = _bn_act_res_kernel
        operands = (conv_out, scale, shift, residual)
        in_specs = [row_spec, vec_spec, vec_spec, row_spec]

    return pl.pallas_call(
        kernel,
        grid=(n,),
        out_shape=jax.ShapeDtypeStruct((n, h, wc), out_dtype),
        in_specs=in_specs,
        out_specs=row_spec,
        compiler_params=pltpu.CompilerParams(
            dimension_semantics=("parallel",),
            vmem_limit_bytes=_VMEM_LIMIT),
    )(*operands)


@jax.jit
def resblock_forward(x_nchw, params):
    """ResBlock forward: relu(bn(conv2(relu(bn(conv1(x)))))) + x."""
    x = jnp.transpose(x_nchw, (0, 2, 3, 1))        # NCHW -> NHWC
    n, h, w, c = x.shape

    # Block 1 (no residual); keep the intermediate activation in bf16.
    h1 = _conv_bn_act_block(x, params["w1"], params["g1"], params["b1"],
                            residual=None, out_dtype=jnp.bfloat16)

    # Block 2 + residual add with the original input (lane-folded layout).
    out = _conv_bn_act_block(h1.reshape(n, h, w, c),
                             params["w2"], params["g2"], params["b2"],
                             residual=x.reshape(n, h, w * c),
                             out_dtype=jnp.float32)

    return jnp.transpose(out.reshape(n, h, w, c), (0, 3, 1, 2))  # NHWC -> NCHW


# ----------------------- pure-JAX reference (for checking) ------------------
def _ref_conv_bn_relu(x_nhwc, w_hwio, gamma, beta, padding=1):
    y = lax.conv_general_dilated(
        x_nhwc, w_hwio, window_strides=(1, 1),
        padding=[(padding, padding), (padding, padding)],
        dimension_numbers=("NHWC", "HWIO", "NHWC"))
    mean = jnp.mean(y, axis=(0, 1, 2), keepdims=True)
    var = jnp.mean((y - mean) ** 2, axis=(0, 1, 2), keepdims=True)
    y = (y - mean) * lax.rsqrt(var + _BN_EPS) * gamma + beta
    return jnp.maximum(y, 0.0)


def _ref_resblock(x_nchw, params, padding=1):
    x = jnp.transpose(x_nchw, (0, 2, 3, 1))
    h1 = _ref_conv_bn_relu(x, params["w1"], params["g1"], params["b1"], padding)
    h2 = _ref_conv_bn_relu(h1, params["w2"], params["g2"], params["b2"], padding)
    return jnp.transpose(h2 + x, (0, 3, 1, 2))


if __name__ == "__main__":
    key = jax.random.PRNGKey(0)
    k_x, k_w1, k_w2 = jax.random.split(key, 3)

    N, C, H, W = 2, 8, 16, 16       # W * C = 128 -> fully lane-dense layout
    KH = KW = 3

    x = jax.random.normal(k_x, (N, C, H, W), dtype=jnp.float32)
    params = {
        # conv weights in HWIO layout (deterministic synthetic init)
        "w1": 0.1 * jax.random.normal(k_w1, (KH, KW, C, C), dtype=jnp.float32),
        "w2": 0.1 * jax.random.normal(k_w2, (KH, KW, C, C), dtype=jnp.float32),
        # BatchNorm2d default init: weight=1, bias=0
        "g1": jnp.ones((C,), jnp.float32),
        "b1": jnp.zeros((C,), jnp.float32),
        "g2": jnp.ones((C,), jnp.float32),
        "b2": jnp.zeros((C,), jnp.float32),
    }

    out = jax.block_until_ready(resblock_forward(x, params))
    ref = _ref_resblock(x, params)

    assert out.shape == (N, C, H, W), out.shape
    # bf16 MXU operands + bf16 intermediate activation -> relaxed tolerance vs
    # the all-f32 reference (as flagged in the performance review).
    max_err = float(jnp.max(jnp.abs(out - ref)))
    assert jnp.allclose(out, ref, atol=5e-2, rtol=5e-2), max_err

    print("KERNEL_OK")
</pallas_src>

<mosaic_0001>
module attributes {stable_mosaic.version = 11 : i64} {
  func.func @_conv_stats_kernel(%arg0: i32, %arg1: memref<1x18x144xbf16, #tpu.memory_space<vmem>>, %arg2: memref<3x144x128xbf16, #tpu.memory_space<vmem>>, %arg3: memref<1x16x128xf32, #tpu.memory_space<vmem>>, %arg4: memref<1x128xf32, #tpu.memory_space<vmem>>, %arg5: memref<1x128xf32, #tpu.memory_space<vmem>>) attributes {dimension_semantics = [#tpu.dimension_semantics<arbitrary>], iteration_bounds = array<i64: 2>, scalar_prefetch = 0 : i64, scratch_operands = 0 : i64, tpu.core_type = #tpu.core_type<tc>, window_params = [{transform_indices = @transform_0, window_bounds = array<i64: 1, 18, 144>}, {pipeline_mode = #tpu.pipeline_mode<synchronous>, transform_indices = @transform_1, window_bounds = array<i64: 3, 144, 128>}, {transform_indices = @transform_2, window_bounds = array<i64: 1, 16, 128>}, {pipeline_mode = #tpu.pipeline_mode<synchronous>, transform_indices = @transform_3, window_bounds = array<i64: 1, 128>}, {pipeline_mode = #tpu.pipeline_mode<synchronous>, transform_indices = @transform_4, window_bounds = array<i64: 1, 128>}]} {
    %c0 = arith.constant 0 : index
    %c0_0 = arith.constant 0 : index
    %c0_1 = arith.constant 0 : index
    %0 = vector.load %arg1[%c0, %c0_0, %c0_1] : memref<1x18x144xbf16, #tpu.memory_space<vmem>>, vector<1x18x144xbf16>
    %1 = vector.shape_cast %0 : vector<1x18x144xbf16> to vector<18x144xbf16>
    %cst = arith.constant 0.000000e+00 : f32
    %2 = vector.broadcast %cst : f32 to vector<16x128xf32>
    %3 = vector.extract_strided_slice %1 {offsets = [0, 0], sizes = [16, 144], strides = [1, 1]} : vector<18x144xbf16> to vector<16x144xbf16>
    %c0_2 = arith.constant 0 : index
    %c0_3 = arith.constant 0 : index
    %c0_4 = arith.constant 0 : index
    %4 = vector.load %arg2[%c0_2, %c0_3, %c0_4] : memref<3x144x128xbf16, #tpu.memory_space<vmem>>, vector<1x144x128xbf16>
    %5 = vector.shape_cast %4 : vector<1x144x128xbf16> to vector<144x128xbf16>
    %cst_5 = arith.constant dense<0.000000e+00> : vector<16x128xf32>
    %6 = tpu.matmul %3, %5, %cst_5 {dimension_numbers = #tpu.dot_dimension_numbers<[1], [0], [0], [1], [0, 0, 1, 1], [], []>} : vector<16x144xbf16>, vector<144x128xbf16>, vector<16x128xf32> -> vector<16x128xf32>
    %7 = arith.addf %2, %6 : vector<16x128xf32>
    %8 = vector.extract_strided_slice %1 {offsets = [1, 0], sizes = [16, 144], strides = [1, 1]} : vector<18x144xbf16> to vector<16x144xbf16>
    %c1 = arith.constant 1 : index
    %c0_6 = arith.constant 0 : index
    %c0_7 = arith.constant 0 : index
    %9 = vector.load %arg2[%c1, %c0_6, %c0_7] : memref<3x144x128xbf16, #tpu.memory_space<vmem>>, vector<1x144x128xbf16>
    %10 = vector.shape_cast %9 : vector<1x144x128xbf16> to vector<144x128xbf16>
    %cst_8 = arith.constant dense<0.000000e+00> : vector<16x128xf32>
    %11 = tpu.matmul %8, %10, %cst_8 {dimension_numbers = #tpu.dot_dimension_numbers<[1], [0], [0], [1], [0, 0, 1, 1], [], []>} : vector<16x144xbf16>, vector<144x128xbf16>, vector<16x128xf32> -> vector<16x128xf32>
    %12 = arith.addf %7, %11 : vector<16x128xf32>
    %13 = vector.extract_strided_slice %1 {offsets = [2, 0], sizes = [16, 144], strides = [1, 1]} : vector<18x144xbf16> to vector<16x144xbf16>
    %c2 = arith.constant 2 : index
    %c0_9 = arith.constant 0 : index
    %c0_10 = arith.constant 0 : index
    %14 = vector.load %arg2[%c2, %c0_9, %c0_10] : memref<3x144x128xbf16, #tpu.memory_space<vmem>>, vector<1x144x128xbf16>
    %15 = vector.shape_cast %14 : vector<1x144x128xbf16> to vector<144x128xbf16>
    %cst_11 = arith.constant dense<0.000000e+00> : vector<16x128xf32>
    %16 = tpu.matmul %13, %15, %cst_11 {dimension_numbers = #tpu.dot_dimension_numbers<[1], [0], [0], [1], [0, 0, 1, 1], [], []>} : vector<16x144xbf16>, vector<144x128xbf16>, vector<16x128xf32> -> vector<16x128xf32>
    %17 = arith.addf %12, %16 : vector<16x128xf32>
    %c0_12 = arith.constant 0 : index
    %c0_13 = arith.constant 0 : index
    %c0_14 = arith.constant 0 : index
    %18 = vector.load %arg3[%c0_12, %c0_13, %c0_14] : memref<1x16x128xf32, #tpu.memory_space<vmem>>, vector<1x16x128xf32>
    %19 = vector.shape_cast %18 : vector<1x16x128xf32> to vector<16x128xf32>
    %20 = vector.shape_cast %17 : vector<16x128xf32> to vector<1x16x128xf32>
    tpu.vector_store %arg3[%c0_12, %c0_13, %c0_14], %20 {strides = array<i32>} : memref<1x16x128xf32, #tpu.memory_space<vmem>>, vector<1x16x128xf32>,
    %c0_i32 = arith.constant 0 : i32
    %21 = arith.cmpi eq, %arg0, %c0_i32 : i32
    %22 = arith.extui %21 : i1 to i32
    %c0_i32_15 = arith.constant 0 : i32
    %23 = arith.cmpi ne, %22, %c0_i32_15 : i32
    scf.if %23 {
      %cst_26 = arith.constant 0.000000e+00 : f32
      %35 = vector.broadcast %cst_26 : f32 to vector<1x128xf32>
      %c0_27 = arith.constant 0 : index
      %c0_28 = arith.constant 0 : index
      %36 = vector.load %arg4[%c0_27, %c0_28] : memref<1x128xf32, #tpu.memory_space<vmem>>, vector<1x128xf32>
      tpu.vector_store %arg4[%c0_27, %c0_28], %35 {strides = array<i32>} : memref<1x128xf32, #tpu.memory_space<vmem>>, vector<1x128xf32>,
      %cst_29 = arith.constant 0.000000e+00 : f32
      %37 = vector.broadcast %cst_29 : f32 to vector<1x128xf32>
      %c0_30 = arith.constant 0 : index
      %c0_31 = arith.constant 0 : index
      %38 = vector.load %arg5[%c0_30, %c0_31] : memref<1x128xf32, #tpu.memory_space<vmem>>, vector<1x128xf32>
      tpu.vector_store %arg5[%c0_30, %c0_31], %37 {strides = array<i32>} : memref<1x128xf32, #tpu.memory_space<vmem>>, vector<1x128xf32>,
    } else {
    }
    %c0_16 = arith.constant 0 : index
    %c0_17 = arith.constant 0 : index
    %24 = vector.load %arg4[%c0_16, %c0_17] : memref<1x128xf32, #tpu.memory_space<vmem>>, vector<1x128xf32>
    %cst_18 = arith.constant dense<0.000000e+00> : vector<128xf32>
    %25 = vector.multi_reduction <add>, %17, %cst_18 [0] : vector<16x128xf32> to vector<128xf32>
    %26 = vector.shape_cast %25 : vector<128xf32> to vector<1x128xf32>
    %27 = arith.addf %24, %26 : vector<1x128xf32>
    %c0_19 = arith.constant 0 : index
    %c0_20 = arith.constant 0 : index
    %28 = vector.load %arg4[%c0_19, %c0_20] : memref<1x128xf32, #tpu.memory_space<vmem>>, vector<1x128xf32>
    tpu.vector_store %arg4[%c0_19, %c0_20], %27 {strides = array<i32>} : memref<1x128xf32, #tpu.memory_space<vmem>>, vector<1x128xf32>,
    %c0_21 = arith.constant 0 : index
    %c0_22 = arith.constant 0 : index
    %29 = vector.load %arg5[%c0_21, %c0_22] : memref<1x128xf32, #tpu.memory_space<vmem>>, vector<1x128xf32>
    %30 = arith.mulf %17, %17 : vector<16x128xf32>
    %cst_23 = arith.constant dense<0.000000e+00> : vector<128xf32>
    %31 = vector.multi_reduction <add>, %30, %cst_23 [0] : vector<16x128xf32> to vector<128xf32>
    %32 = vector.shape_cast %31 : vector<128xf32> to vector<1x128xf32>
    %33 = arith.addf %29, %32 : vector<1x128xf32>
    %c0_24 = arith.constant 0 : index
    %c0_25 = arith.constant 0 : index
    %34 = vector.load %arg5[%c0_24, %c0_25] : memref<1x128xf32, #tpu.memory_space<vmem>>, vector<1x128xf32>
    tpu.vector_store %arg5[%c0_24, %c0_25], %33 {strides = array<i32>} : memref<1x128xf32, #tpu.memory_space<vmem>>, vector<1x128xf32>,
    return
  }
  func.func @transform_0(%arg0: i32) -> (i32, i32, i32) {
    %c0_i32 = arith.constant 0 : i32
    %c0_i32_0 = arith.constant 0 : i32
    %c0_i32_1 = arith.constant 0 : i32
    return %arg0, %c0_i32, %c0_i32_0 : i32, i32, i32
  }
  func.func @transform_1(%arg0: i32) -> (i32, i32, i32) {
    %c0_i32 = arith.constant 0 : i32
    %c0_i32_0 = arith.constant 0 : i32
    %c0_i32_1 = arith.constant 0 : i32
    %c0_i32_2 = arith.constant 0 : i32
    return %c0_i32, %c0_i32_0, %c0_i32_1 : i32, i32, i32
  }
  func.func @transform_2(%arg0: i32) -> (i32, i32, i32) {
    %c0_i32 = arith.constant 0 : i32
    %c0_i32_0 = arith.constant 0 : i32
    %c0_i32_1 = arith.constant 0 : i32
    return %arg0, %c0_i32, %c0_i32_0 : i32, i32, i32
  }
  func.func @transform_3(%arg0: i32) -> (i32, i32) {
    %c0_i32 = arith.constant 0 : i32
    %c0_i32_0 = arith.constant 0 : i32
    %c0_i32_1 = arith.constant 0 : i32
    return %c0_i32, %c0_i32_0 : i32, i32
  }
  func.func @transform_4(%arg0: i32) -> (i32, i32) {
    %c0_i32 = arith.constant 0 : i32
    %c0_i32_0 = arith.constant 0 : i32
    %c0_i32_1 = arith.constant 0 : i32
    return %c0_i32, %c0_i32_0 : i32, i32
  }
}

module attributes {stable_mosaic.version = 11 : i64} {
  func.func @_bn_act_kernel(%arg0: i32, %arg1: memref<1x16x128xf32, #tpu.memory_space<vmem>>, %arg2: memref<1x128xf32, #tpu.memory_space<vmem>>, %arg3: memref<1x128xf32, #tpu.memory_space<vmem>>, %arg4: memref<1x16x128xbf16, #tpu.memory_space<vmem>>) attributes {dimension_semantics = [#tpu.dimension_semantics<parallel>], iteration_bounds = array<i64: 2>, scalar_prefetch = 0 : i64, scratch_operands = 0 : i64, tpu.core_type = #tpu.core_type<tc>, window_params = [{transform_indices = @transform_0, window_bounds = array<i64: 1, 16, 128>}, {pipeline_mode = #tpu.pipeline_mode<synchronous>, transform_indices = @transform_1, window_bounds = array<i64: 1, 128>}, {pipeline_mode = #tpu.pipeline_mode<synchronous>, transform_indices = @transform_2, window_bounds = array<i64: 1, 128>}, {transform_indices = @transform_3, window_bounds = array<i64: 1, 16, 128>}]} {
    %c0 = arith.constant 0 : index
    %c0_0 = arith.constant 0 : index
    %c0_1 = arith.constant 0 : index
    %0 = vector.load %arg1[%c0, %c0_0, %c0_1] : memref<1x16x128xf32, #tpu.memory_space<vmem>>, vector<1x16x128xf32>
    %1 = vector.shape_cast %0 : vector<1x16x128xf32> to vector<16x128xf32>
    %c0_2 = arith.constant 0 : index
    %c0_3 = arith.constant 0 : index
    %2 = vector.load %arg2[%c0_2, %c0_3] : memref<1x128xf32, #tpu.memory_space<vmem>>, vector<1x128xf32>
    %3 = vector.broadcast %2 : vector<1x128xf32> to vector<16x128xf32>
    %4 = arith.mulf %1, %3 : vector<16x128xf32>
    %c0_4 = arith.constant 0 : index
    %c0_5 = arith.constant 0 : index
    %5 = vector.load %arg3[%c0_4, %c0_5] : memref<1x128xf32, #tpu.memory_space<vmem>>, vector<1x128xf32>
    %6 = vector.broadcast %5 : vector<1x128xf32> to vector<16x128xf32>
    %7 = arith.addf %4, %6 : vector<16x128xf32>
    %cst = arith.constant 0.000000e+00 : f32
    %8 = vector.broadcast %cst : f32 to vector<16x128xf32>
    %9 = arith.maximumf %7, %8 : vector<16x128xf32>
    %10 = arith.truncf %9 : vector<16x128xf32> to vector<16x128xbf16>
    %c0_6 = arith.constant 0 : index
    %c0_7 = arith.constant 0 : index
    %c0_8 = arith.constant 0 : index
    %11 = vector.load %arg4[%c0_6, %c0_7, %c0_8] : memref<1x16x128xbf16, #tpu.memory_space<vmem>>, vector<1x16x128xbf16>
    %12 = vector.shape_cast %11 : vector<1x16x128xbf16> to vector<16x128xbf16>
    %13 = vector.shape_cast %10 : vector<16x128xbf16> to vector<1x16x128xbf16>
    tpu.vector_store %arg4[%c0_6, %c0_7, %c0_8], %13 {strides = array<i32>} : memref<1x16x128xbf16, #tpu.memory_space<vmem>>, vector<1x16x128xbf16>,
    return
  }
  func.func @transform_0(%arg0: i32) -> (i32, i32, i32) {
    %c0_i32 = arith.constant 0 : i32
    %c0_i32_0 = arith.constant 0 : i32
    %c0_i32_1 = arith.constant 0 : i32
    return %arg0, %c0_i32, %c0_i32_0 : i32, i32, i32
  }
  func.func @transform_1(%arg0: i32) -> (i32, i32) {
    %c0_i32 = arith.constant 0 : i32
    %c0_i32_0 = arith.constant 0 : i32
    %c0_i32_1 = arith.constant 0 : i32
    return %c0_i32, %c0_i32_0 : i32, i32
  }
  func.func @transform_2(%arg0: i32) -> (i32, i32) {
    %c0_i32 = arith.constant 0 : i32
    %c0_i32_0 = arith.constant 0 : i32
    %c0_i32_1 = arith.constant 0 : i32
    return %c0_i32, %c0_i32_0 : i32, i32
  }
  func.func @transform_3(%arg0: i32) -> (i32, i32, i32) {
    %c0_i32 = arith.constant 0 : i32
    %c0_i32_0 = arith.constant 0 : i32
    %c0_i32_1 = arith.constant 0 : i32
    return %arg0, %c0_i32, %c0_i32_0 : i32, i32, i32
  }
}

module attributes {stable_mosaic.version = 11 : i64} {
  func.func @_bn_act_res_kernel(%arg0: i32, %arg1: memref<1x16x128xf32, #tpu.memory_space<vmem>>, %arg2: memref<1x128xf32, #tpu.memory_space<vmem>>, %arg3: memref<1x128xf32, #tpu.memory_space<vmem>>, %arg4: memref<1x16x128xf32, #tpu.memory_space<vmem>>, %arg5: memref<1x16x128xf32, #tpu.memory_space<vmem>>) attributes {dimension_semantics = [#tpu.dimension_semantics<parallel>], iteration_bounds = array<i64: 2>, scalar_prefetch = 0 : i64, scratch_operands = 0 : i64, tpu.core_type = #tpu.core_type<tc>, window_params = [{transform_indices = @transform_0, window_bounds = array<i64: 1, 16, 128>}, {pipeline_mode = #tpu.pipeline_mode<synchronous>, transform_indices = @transform_1, window_bounds = array<i64: 1, 128>}, {pipeline_mode = #tpu.pipeline_mode<synchronous>, transform_indices = @transform_2, window_bounds = array<i64: 1, 128>}, {transform_indices = @transform_3, window_bounds = array<i64: 1, 16, 128>}, {transform_indices = @transform_4, window_bounds = array<i64: 1, 16, 128>}]} {
    %c0 = arith.constant 0 : index
    %c0_0 = arith.constant 0 : index
    %c0_1 = arith.constant 0 : index
    %0 = vector.load %arg1[%c0, %c0_0, %c0_1] : memref<1x16x128xf32, #tpu.memory_space<vmem>>, vector<1x16x128xf32>
    %1 = vector.shape_cast %0 : vector<1x16x128xf32> to vector<16x128xf32>
    %c0_2 = arith.constant 0 : index
    %c0_3 = arith.constant 0 : index
    %2 = vector.load %arg2[%c0_2, %c0_3] : memref<1x128xf32, #tpu.memory_space<vmem>>, vector<1x128xf32>
    %3 = vector.broadcast %2 : vector<1x128xf32> to vector<16x128xf32>
    %4 = arith.mulf %1, %3 : vector<16x128xf32>
    %c0_4 = arith.constant 0 : index
    %c0_5 = arith.constant 0 : index
    %5 = vector.load %arg3[%c0_4, %c0_5] : memref<1x128xf32, #tpu.memory_space<vmem>>, vector<1x128xf32>
    %6 = vector.broadcast %5 : vector<1x128xf32> to vector<16x128xf32>
    %7 = arith.addf %4, %6 : vector<16x128xf32>
    %cst = arith.constant 0.000000e+00 : f32
    %8 = vector.broadcast %cst : f32 to vector<16x128xf32>
    %9 = arith.maximumf %7, %8 : vector<16x128xf32>
    %c0_6 = arith.constant 0 : index
    %c0_7 = arith.constant 0 : index
    %c0_8 = arith.constant 0 : index
    %10 = vector.load %arg4[%c0_6, %c0_7, %c0_8] : memref<1x16x128xf32, #tpu.memory_space<vmem>>, vector<1x16x128xf32>
    %11 = vector.shape_cast %10 : vector<1x16x128xf32> to vector<16x128xf32>
    %12 = arith.addf %9, %11 : vector<16x128xf32>
    %c0_9 = arith.constant 0 : index
    %c0_10 = arith.constant 0 : index
    %c0_11 = arith.constant 0 : index
    %13 = vector.load %arg5[%c0_9, %c0_10, %c0_11] : memref<1x16x128xf32, #tpu.memory_space<vmem>>, vector<1x16x128xf32>
    %14 = vector.shape_cast %13 : vector<1x16x128xf32> to vector<16x128xf32>
    %15 = vector.shape_cast %12 : vector<16x128xf32> to vector<1x16x128xf32>
    tpu.vector_store %arg5[%c0_9, %c0_10, %c0_11], %15 {strides = array<i32>} : memref<1x16x128xf32, #tpu.memory_space<vmem>>, vector<1x16x128xf32>,
    return
  }
  func.func @transform_0(%arg0: i32) -> (i32, i32, i32) {
    %c0_i32 = arith.constant 0 : i32
    %c0_i32_0 = arith.constant 0 : i32
    %c0_i32_1 = arith.constant 0 : i32
    return %arg0, %c0_i32, %c0_i32_0 : i32, i32, i32
  }
  func.func @transform_1(%arg0: i32) -> (i32, i32) {
    %c0_i32 = arith.constant 0 : i32
    %c0_i32_0 = arith.constant 0 : i32
    %c0_i32_1 = arith.constant 0 : i32
    return %c0_i32, %c0_i32_0 : i32, i32
  }
  func.func @transform_2(%arg0: i32) -> (i32, i32) {
    %c0_i32 = arith.constant 0 : i32
    %c0_i32_0 = arith.constant 0 : i32
    %c0_i32_1 = arith.constant 0 : i32
    return %c0_i32, %c0_i32_0 : i32, i32
  }
  func.func @transform_3(%arg0: i32) -> (i32, i32, i32) {
    %c0_i32 = arith.constant 0 : i32
    %c0_i32_0 = arith.constant 0 : i32
    %c0_i32_1 = arith.constant 0 : i32
    return %arg0, %c0_i32, %c0_i32_0 : i32, i32, i32
  }
  func.func @transform_4(%arg0: i32) -> (i32, i32, i32) {
    %c0_i32 = arith.constant 0 : i32
    %c0_i32_0 = arith.constant 0 : i32
    %c0_i32_1 = arith.constant 0 : i32
    return %arg0, %c0_i32, %c0_i32_0 : i32, i32, i32
  }
}

</mosaic_0001>

<bundles_post_ra>
// kernel: resblock_forward.4
= control target key start
LH: loop header
LB: loop body
LE: loop exit
PB: predicated region body
PF: predicated region fallthrough
CT: control target
= control target key end

     0   :  { %s860_s15 = smov 0   ;;  %s1030_s0 = inlined_call_operand.vmem [shape: bf16[2,18,144], index: 0, kind: input, shape index: {}]   ;;  %s1031_s1 = inlined_call_operand.vmem [shape: bf16[3,144,128], index: 1, kind: input, shape index: {}]   ;;  %s1032_s2 = inlined_call_operand.vmem [shape: f32[2,16,128], index: 2, kind: output, shape index: {0}]   ;;  %s1033_s3 = inlined_call_operand.vmem [shape: f32[1,128], index: 3, kind: output, shape index: {1}]   ;;  %s1034_s4 = inlined_call_operand.vmem [shape: f32[1,128], index: 4, kind: output, shape index: {2}]  }
   0x1 LB: > { %s866_s16 = sadd.s32 4294967295, %s831_s15   ;;  %p698_p0 = scmp.ge.s32.totalorder %s831_s15, 1  ;;  %s831_s15 = sphi %s860_s15, %s15_s15  }
   0x2   : > { %p157_p1 = scmp.lt.s32.totalorder %s831_s15, 3 }
   0x4   : > { %p158_p2 = pnand %p698_p0, %p157_p1 }
   0x5   : > { %v793_v0 = vld [vmem:[%s1031_s1] sm:$0xff] (!%p158_p2)   ;;  %v833_v1 = vmov (!%p158_p2), 0   ;;  %p183_p3 = scmp.lt.s32.totalorder (!%p158_p2), %s866_s16, 1  ;;  %v794_v2 = vld [vmem:[%s1031_s1 + $0x8] sm:$0xff] (!%p158_p2)   ;;  %v795_v3 = vld [vmem:[%s1031_s1 + $0x10] sm:$0xff] (!%p158_p2)   ;;  %vm327_vm0 = vcmask (!%p158_p2), 130048  }
   0x6   : > { %161 = sbr.rel (%p158_p2) target bundleno = 314 (0x13a), region = 28  ;;  %429 = vmatprep.subr.bf16.mxu0 (!%p158_p2), %v833_v1  ;;  %331 = vmatprep.subr.bf16.mxu1 (!%p158_p2), %v833_v1  ;;  %v796_v4 = vld [vmem:[%s1031_s1 + $0x18] sm:$0xff] (!%p158_p2)   ;;  %v802_v5 = vld [vmem:[%s1031_s1 + $0x48] sm:$0xff] (!%p158_p2)   ;;  %v807_v7 = vld [vmem:[%s1031_s1 + $0x50] sm:$0xff] (!%p158_p2)   ;;  %vm247_vm1 = vsmask.f32 (!%p158_p2), 7424 }
   0x7   : > { %430 = vmatpush1.bf16.msra.mxu0 (!%p158_p2), %v793_v0  ;;  %332 = vmatpush1.bf16.msra.mxu1 (!%p158_p2), %v802_v5  ;;  %v797_v8 = vld [vmem:[%s1031_s1 + $0x20] sm:$0xff] (!%p158_p2)   ;;  %v809_v9 = vld [vmem:[%s1031_s1 + $0x58] sm:$0xff] (!%p158_p2)   ;;  %v798_v10 = vld [vmem:[%s1031_s1 + $0x28] sm:$0xff] (!%p158_p2)   ;;  %vm489_vm2 = vcmask (!%p158_p2), 1046528   ;;  %p772_p4 = scmp.ne.s32.totalorder (!%p158_p2), %s866_s16, 0 }
   0x8   : > { %431 = vmatprep.subr.bf16.mxu0 (!%p158_p2), %v833_v1  ;;  %333 = vmatprep.subr.bf16.mxu1 (!%p158_p2), %v833_v1  ;;  %v811_v11 = vld [vmem:[%s1031_s1 + $0x60] sm:$0xff] (!%p158_p2)   ;;  %v799_v12 = vld [vmem:[%s1031_s1 + $0x30] sm:$0xff] (!%p158_p2)   ;;  %v813_v14 = vld [vmem:[%s1031_s1 + $0x68] sm:$0xff] (!%p158_p2)  }
   0x9   : > { %v800_v15 = vld [vmem:[%s1031_s1 + $0x38] sm:$0xff] (!%p158_p2)   ;;  %v815_v18 = vld [vmem:[%s1031_s1 + $0x70] sm:$0xff] (!%p158_p2)   ;;  %v801_v22 = vld [vmem:[%s1031_s1 + $0x40] sm:$0xff] (!%p158_p2)  }
   0xa   : > { %v817_v25 = vld [vmem:[%s1031_s1 + $0x78] sm:$0xff] (!%p158_p2)   ;;  %v806_v31 = vld [vmem:[%s1031_s1 + $0x90] sm:$0xff] (!%p158_p2)   ;;  %v819_v33 = vld [vmem:[%s1031_s1 + $0x80] sm:$0xff] (!%p158_p2)  }
   0xb   : > { %432 = vmatpush1.bf16.msra.mxu0 (!%p158_p2), %v794_v2  ;;  %334 = vmatpush1.bf16.msra.mxu1 (!%p158_p2), %v807_v7  ;;  %v808_v38 = vld [vmem:[%s1031_s1 + $0x98] sm:$0xff] (!%p158_p2)   ;;  %v821_v39 = vld [vmem:[%s1031_s1 + $0x88] sm:$0xff] (!%p158_p2)   ;;  %v810_v42 = vld [vmem:[%s1031_s1 + $0xa0] sm:$0xff] (!%p158_p2)  }
   0xc   : > { %433 = vmatprep.subr.bf16.mxu0 (!%p158_p2), %v833_v1  ;;  %335 = vmatprep.subr.bf16.mxu1 (!%p158_p2), %v833_v1  ;;  %v812_v44 = vld [vmem:[%s1031_s1 + $0xa8] sm:$0xff] (!%p158_p2)   ;;  %v814_v45 = vld [vmem:[%s1031_s1 + $0xb0] sm:$0xff] (!%p158_p2)   ;;  %v816_v46 = vld [vmem:[%s1031_s1 + $0xb8] sm:$0xff] (!%p158_p2)  }
   0xd   : > { %s881_s21 = scalar_select %p183_p3, %s866_s16, 1  ;;  %v818_v47 = vld [vmem:[%s1031_s1 + $0xc0] sm:$0xff]   ;;  %v820_v48 = vld [vmem:[%s1031_s1 + $0xc8] sm:$0xff]   ;;  %v824_v49 = vld [vmem:[%s1031_s1 + $0xd0] sm:$0xff]  }
   0xe   : > { %v834_v63 = vmov (!%p772_p4), 0.0  }
   0xf   : > { %s782_s22 = smul.u32 24, %s881_s21  ;;  %434 = vmatpush1.bf16.msra.mxu0 %v795_v3  ;;  %336 = vmatpush1.bf16.msra.mxu1 %v809_v9  ;;  %s775_s5 = sshll.u32 %s881_s21, 4  ;;  %603 = vst [vmem:[%s1033_s3] sm:$0x1] (!%p772_p4), %v834_v63  ;;  %604 = vst [vmem:[%s1034_s4] sm:$0x1] (!%p772_p4), %v834_v63 }
  0x10   : > { %435 = vmatprep.subr.bf16.mxu0 %v833_v1  ;;  %337 = vmatprep.subr.bf16.mxu1 %v833_v1  ;;  %s192_s7 = scalar_lea.vmem %s1032_s2, %s775_s5 }
  0x11   : > { %s891_s27 = scalar_lea.vmem %s1030_s0, %s782_s22 }
  0x12   : > { %v803_v6 = vld [vmem:[%s891_s27 + $0x4] ss:$8 sps:$4 sm:$0xff]   ;;  %v196_v19 = vld [vmem:[%s891_s27 + $0x10] sm:$0x11]  ;;  %v940_v21 = vld [vmem:[%s891_s27] ss:$8 sps:$4 sm:$0xff]  }
  0x13   : > { %743 = vmatprep.mubr.msk.bf16.mxu0 %vm327_vm0, %v803_v6  ;;  %436 = vmatpush1.bf16.msra.mxu0 %v796_v4  ;;  %v263_v13 = vshll.u32 %v803_v6, 16  ;;  %v261_v16 = vshrl.u32 %v803_v6, 16  ;;  %v723_v20 = vcombine.high %v196_v19, %v196_v19  ;;  %v722_v26 = vcombine.low %v196_v19, %v196_v19 }
  0x14   : > { %437 = vmatprep.subr.bf16.mxu0 %v833_v1  ;;  %338 = vmatpush1.bf16.msra.mxu1 %v811_v11  ;;  %v251_v27 = vshll.u32 %v940_v21, 16  ;;  %v493_v28 = vrot.slane %v803_v6, 1  ;;  %v249_v34 = vshrl.u32 %v940_v21, 16  ;;  %v490_v50 = vrot.slane %v940_v21, 1 }
  0x15   : > { %339 = vmatprep.subr.bf16.mxu1 %v833_v1  ;;  %v265_v17 = vrot.slane %v263_v13, 1  ;;  %v268_v24 = vshll.u32 %v723_v20, 16  ;;  %v494_v29 = vrot.slane %v723_v20, 1  ;;  %v256_v36 = vshll.u32 %v722_v26, 16 }
  0x16   : > { %v253_v35 = vrot.slane %v251_v27, 1  ;;  %v491_v51 = vrot.slane %v722_v26, 1 }
  0x17   : > { %438 = vmatpush1.bf16.msra.mxu0 %v797_v8  ;;  %v266_v23 = vor.u32 %v265_v17, %v261_v16  ;;  %v270_v30 = vrot.slane %v268_v24, 1  ;;  %v495_v37 = vsel %vm489_vm2, %v493_v28, %v494_v29  ;;  %v258_v41 = vrot.slane %v256_v36, 1 }
  0x18   : > { %439 = vmatprep.subr.bf16.mxu0 %v833_v1  ;;  %340 = vmatpush1.bf16.msra.mxu1 %v813_v14  ;;  %v254_v40 = vor.u32 %v253_v35, %v249_v34  ;;  %v492_v52 = vsel %vm489_vm2, %v490_v50, %v491_v51 }
  0x19   : > { %341 = vmatprep.subr.bf16.mxu1 %v833_v1  ;;  %v271_v32 = vsel %vm247_vm1, %v266_v23, %v270_v30 }
  0x1a   : > { %733 = vmatprep.mubr.msk.bf16.mxu1 %vm327_vm0, %v271_v32  ;;  %v259_v43 = vsel %vm247_vm1, %v254_v40, %v258_v41 }
  0x1b   : > { %440 = vmatpush1.bf16.msra.mxu0 %v798_v10 }
  0x1c   : > { %441 = vmatprep.subr.bf16.mxu0 %v833_v1  ;;  %342 = vmatpush1.bf16.msra.mxu1 %v815_v18 }
  0x1d   : > { %343 = vmatprep.subr.bf16.mxu1 %v833_v1 }
  0x1f   : > { %442 = vmatpush1.bf16.msra.mxu0 %v799_v12 }
  0x20   : > { %443 = vmatprep.subr.bf16.mxu0 %v833_v1  ;;  %344 = vmatpush1.bf16.msra.mxu1 %v817_v25 }
  0x21   : > { %345 = vmatprep.subr.bf16.mxu1 %v833_v1 }
  0x23   : > { %444 = vmatpush1.bf16.msra.mxu0 %v800_v15 }
  0x24   : > { %445 = vmatprep.subr.bf16.mxu0 %v833_v1  ;;  %346 = vmatpush1.bf16.msra.mxu1 %v819_v33 }
  0x25   : > { %347 = vmatprep.subr.bf16.mxu1 %v833_v1 }
  0x27   : > { %446 = vmatpush1.bf16.msra.mxu0 %v801_v22 }
  0x28   : > { %554 = vmatprep.subr.bf16.mxu0 %v833_v1  ;;  %348 = vmatpush1.bf16.msra.mxu1 %v821_v39 }
  0x2a   : > { %462 = vmatmul.mubr.bf16.vlgmr.msra.gmra.mrb[0].mxu0 %v940_v21 }
  0x2b   : > { %555 = vmatpush1.bf16.msra.mxu0 %v806_v31  ;;  %771 = vmatprep.mubr.msk.bf16.mxu0 %vm327_vm0, %v495_v37 }
  0x2c   : > { %556 = vmatprep.subr.bf16.mxu0 %v833_v1  ;;  %364 = vmatmul.mubr.bf16.vlgmr.msra.gmra.mrb[0].mxu1 %v259_v43 }
  0x2f   : > { %557 = vmatpush1.bf16.msra.mxu0 %v808_v38 }
  0x30   : > { %558 = vmatprep.subr.bf16.mxu0 %v833_v1 }
  0x33   : > { %559 = vmatpush1.bf16.msra.mxu0 %v810_v42 }
  0x34   : > { %560 = vmatprep.subr.bf16.mxu0 %v833_v1 }
  0x37   : > { %561 = vmatpush1.bf16.msra.mxu0 %v812_v44 }
  0x38   : > { %562 = vmatprep.subr.bf16.mxu0 %v833_v1 }
  0x3b   : > { %563 = vmatpush1.bf16.msra.mxu0 %v814_v45 }
  0x3c   : > { %564 = vmatprep.subr.bf16.mxu0 %v833_v1 }
  0x3f   : > { %565 = vmatpush1.bf16.msra.mxu0 %v816_v46 }
  0x40   : > { %566 = vmatprep.subr.bf16.mxu0 %v833_v1 }
  0x43   : > { %567 = vmatpush1.bf16.msra.mxu0 %v818_v47 }
  0x44   : > { %568 = vmatprep.subr.bf16.mxu0 %v833_v1 }
  0x47   : > { %569 = vmatpush1.bf16.msra.mxu0 %v820_v48 }
  0x48   : > { %570 = vmatprep.subr.bf16.mxu0 %v833_v1 }
  0x4b   : > { %571 = vmatpush1.bf16.msra.mxu0 %v824_v49 }
  0x4e   : > { %587 = vmatmul.mubr.bf16.vlgmr.msra.gmra.mrb[0].mxu0 %v492_v52 }
  0xff   : > { %v365_v53 = vpop.f32.mrb[0].mxu1 }
 0x100   : > { %v367_v54 = vpop.f32.mrb[1].mxu1 }
 0x101   : > { %v368_v55 = vpop.f32.mrb[2].mxu1 }
 0x102   : > { %v370_v56 = vpop.f32.mrb[3].mxu1 }
 0x120   : > { %602 = sbr.rel (%p772_p4) target bundleno = 295 (0x127), region = 32 }
 0x121   : > { %v588_v57 = vpop.f32.mrb[0].mxu0 }
 0x122   : > { %v776_v58 = vadd.f32 %v588_v57, %v365_v53  ;;  %v590_v59 = vpop.f32.mrb[1].mxu0 }
 0x123   : > { %v591_v60 = vpop.f32.mrb[2].mxu0 }
 0x124   : > { %597 = vst [vmem:[%s192_s7] sm:$0xff] %v776_v58  ;;  %v777_v61 = vadd.f32 %v591_v60, %v368_v55  ;;  %v593_v62 = vpop.f32.mrb[3].mxu0 }
 0x126   : > { %598 = vst [vmem:[%s192_s7 + $0x8] sm:$0xff] %v777_v61 }
 0x127 PF: > { %v606_v0 = vadd.f32 %v777_v61, %v776_v58  ;;  %v616_v1 = vmul.f32 %v776_v58, %v776_v58  ;;  %v617_v2 = vmul.f32 %v777_v61, %v777_v61  ;;  %v605_v13 = vld [vmem:[%s1033_s3] sm:$0x1] }
 0x128   : > { %v615_v16 = vld [vmem:[%s1034_s4] sm:$0x1] }
 0x129   : > { %v607_v3 = vrot.slane %v606_v0, 4  ;;  %v618_v4 = vadd.f32 %v617_v2, %v616_v1 }
 0x12b   : > { %v608_v5 = vadd.f32 %v607_v3, %v606_v0  ;;  %v619_v6 = vrot.slane %v618_v4, 4 }
 0x12d   : > { %v609_v7 = vrot.slane %v608_v5, 2  ;;  %v620_v8 = vadd.f32 %v619_v6, %v618_v4 }
 0x12f   : > { %v610_v9 = vadd.f32 %v609_v7, %v608_v5  ;;  %v621_v10 = vrot.slane %v620_v8, 2 }
 0x131   : > { %v611_v11 = vrot.slane %v610_v9, 1  ;;  %v622_v12 = vadd.f32 %v621_v10, %v620_v8 }
 0x133   : > { %v612_v14 = vadd.f32 %v611_v11, %v610_v9  ;;  %v623_v15 = vrot.slane %v622_v12, 1 }
 0x135   : > { %v613_v17 = vadd.f32 %v612_v14, %v605_v13  ;;  %v624_v18 = vadd.f32 %v623_v15, %v622_v12 }
 0x137   : > { %614 = vst [vmem:[%s1033_s3] sm:$0x1] %v613_v17  ;;  %v625_v19 = vadd.f32 %v624_v18, %v615_v16 }
 0x139   : > { %626 = vst [vmem:[%s1034_s4] sm:$0x1] %v625_v19 }
 0x13a PF: > { %s15_s15 = sadd.s32 1, %s831_s15  }
 0x13b   : > { %p12_p5 = scmp.ge.s32.totalorder %s15_s15, 4  }
 0x13d   :  { %14 = sbr.rel (!%p12_p5) target bundleno = 1 (0x1), region = 80 }

// kernel: tile.23
= control target key start
LH: loop header
LB: loop body
LE: loop exit
PB: predicated region body
PF: predicated region fallthrough
CT: control target
= control target key end

     0   :  { %s28_s0 = inlined_call_operand.vmem [shape: f32[8], index: 0, kind: input, shape index: {}]   ;;  %s29_s1 = inlined_call_operand.vmem [shape: f32[16,8], index: 1, kind: output, shape index: {}]  }
   0x1   :  { %v4_v0 = vld [vmem:[%s28_s0] ss:$0 sm:$0xff] }
   0x2   :  { %5 = vst [vmem:[%s29_s1] sm:$0xff] %v4_v0  ;;  %8 = vst [vmem:[%s29_s1 + $0x8] sm:$0xff] %v4_v0 }

// kernel: tile.24
= control target key start
LH: loop header
LB: loop body
LE: loop exit
PB: predicated region body
PF: predicated region fallthrough
CT: control target
= control target key end

     0   :  { %s131_s10 = smov 120   ;;  %s132_s11 = smov 104   ;;  %vm3_vm0 = vcmask 64512   ;;  %vm9_vm1 = vcmask 1048512   ;;  %vm15_vm2 = vcmask 982912   ;;  %vm21_vm3 = vcmask 917312   ;;  %s207_s0 = inlined_call_operand.vmem [shape: f32[16,8], index: 0, kind: input, shape index: {}]   ;;  %s208_s1 = inlined_call_operand.vmem [shape: f32[1,128], index: 1, kind: output, shape index: {}]  }
   0x1   :  { %v101_v0 = vld [vmem:[%s207_s0 + $0xf] sm:$0x1]   ;;  %v103_v1 = vld [vmem:[%s207_s0 + $0xd] sm:$0x1]   ;;  %v102_v2 = vld [vmem:[%s207_s0 + $0xe] sm:$0x1]  }
   0x2   :  { %7 = vrot.lane.b32.xlu0 %v101_v0, %s131_s10  ;;  %19 = vrot.lane.b32.xlu1 %v103_v1, %s132_s11  ;;  %v104_v3 = vld [vmem:[%s207_s0 + $0xc] sm:$0x1]   ;;  %s133_s16 = smov 112   ;;  %s134_s17 = smov 96   ;;  %v105_v4 = vld [vmem:[%s207_s0 + $0xb] sm:$0x1]  }
   0x3   :  { %v106_v5 = vld [vmem:[%s207_s0 + $0xa] sm:$0x1]   ;;  %v2_v6 = vld [vmem:[%s207_s0] sm:$0x1]   ;;  %s135_s24 = smov 88   ;;  %s136_s25 = smov 80  }
   0x4   :  { %4 = vst.msk [vmem:[#allocation0] sm:$0x1] %vm3_vm0, %v2_v6   ;;  %v107_v7 = vld [vmem:[%s207_s0 + $0x9] sm:$0x1]   ;;  %v108_v8 = vld [vmem:[%s207_s0 + $0x8] sm:$0x1]  }
   0x5   :  { %s137_s30 = smov 72   ;;  %s138_s2 = smov 64   ;;  %v109_v9 = vld [vmem:[%s207_s0 + $0x7] sm:$0x1]   ;;  %v110_v10 = vld [vmem:[%s207_s0 + $0x6] sm:$0x1]  }
   0x6   :  { %13 = vrot.lane.b32.xlu0 %v102_v2, %s133_s16  ;;  %25 = vrot.lane.b32.xlu1 %v104_v3, %s134_s17  ;;  %s139_s7 = smov 56   ;;  %s140_s8 = smov 48   ;;  %v111_v11 = vld [vmem:[%s207_s0 + $0x5] sm:$0x1]   ;;  %v112_v12 = vld [vmem:[%s207_s0 + $0x4] sm:$0x1]  }
   0x7   :  { %s141_s13 = smov 40   ;;  %s142_s14 = smov 32   ;;  %v113_v13 = vld [vmem:[%s207_s0 + $0x3] sm:$0x1]   ;;  %v114_v14 = vld [vmem:[%s207_s0 + $0x2] sm:$0x1]  }
   0x8   :  { %s143_s19 = smov 24   ;;  %s144_s20 = smov 16   ;;  %v115_v15 = vld [vmem:[%s207_s0 + $0x1] sm:$0x1]   ;;  %vm27_vm4 = vcmask 851712   ;;  %vm33_vm5 = vcmask 786112  }
   0x9   :  { %s145_s0 = smov 8   ;;  %vm39_vm6 = vcmask 720512   ;;  %vm45_vm7 = vcmask 654912   ;;  %vm51_vm8 = vcmask 589312   ;;  %vm57_vm9 = vcmask 523712  }
   0xa   :  { %31 = vrot.lane.b32.xlu0 %v105_v4, %s135_s24  ;;  %37 = vrot.lane.b32.xlu1 %v106_v5, %s136_s25  ;;  %vm63_vm10 = vcmask 458112   ;;  %vm69_vm11 = vcmask 392512   ;;  %vm75_vm12 = vcmask 326912   ;;  %vm81_vm13 = vcmask 261312  }
   0xb   :  { %vm87_vm14 = vcmask 195712   ;;  %vm93_vm15 = vcmask 130112  }
   0xe   :  { %43 = vrot.lane.b32.xlu0 %v107_v7, %s137_s30  ;;  %49 = vrot.lane.b32.xlu1 %v108_v8, %s138_s2 }
  0x12   :  { %55 = vrot.lane.b32.xlu0 %v109_v9, %s139_s7  ;;  %61 = vrot.lane.b32.xlu1 %v110_v10, %s140_s8 }
  0x16   :  { %67 = vrot.lane.b32.xlu0 %v111_v11, %s141_s13  ;;  %73 = vrot.lane.b32.xlu1 %v112_v12, %s142_s14 }
  0x1a   :  { %79 = vrot.lane.b32.xlu0 %v113_v13, %s143_s19  ;;  %85 = vrot.lane.b32.xlu1 %v114_v14, %s144_s20 }
  0x1e   :  { %91 = vrot.lane.b32.xlu0 %v115_v15, %s145_s0 }
  0x74   :  { %v8_v16 = vpop.permute.xlu0 %7   ;;  %v20_v17 = vpop.permute.xlu1 %19  }
  0x75   :  { %10 = vst.msk [vmem:[#allocation0] sm:$0x1] %vm9_vm1, %v8_v16  }
  0x78   :  { %v14_v18 = vpop.permute.xlu0 %13   ;;  %v26_v19 = vpop.permute.xlu1 %25  }
  0x79   :  { %16 = vst.msk [vmem:[#allocation0] sm:$0x1] %vm15_vm2, %v14_v18  }
  0x7a   :  { %22 = vst.msk [vmem:[#allocation0] sm:$0x1] %vm21_vm3, %v20_v17  }
  0x7b   :  { %28 = vst.msk [vmem:[#allocation0] sm:$0x1] %vm27_vm4, %v26_v19  }
  0x7c   :  { %v32_v20 = vpop.permute.xlu0 %31   ;;  %v38_v21 = vpop.permute.xlu1 %37  }
  0x7d   :  { %34 = vst.msk [vmem:[#allocation0] sm:$0x1] %vm33_vm5, %v32_v20  }
  0x7e   :  { %40 = vst.msk [vmem:[#allocation0] sm:$0x1] %vm39_vm6, %v38_v21  }
  0x80   :  { %v44_v22 = vpop.permute.xlu0 %43   ;;  %v50_v23 = vpop.permute.xlu1 %49  }
  0x81   :  { %46 = vst.msk [vmem:[#allocation0] sm:$0x1] %vm45_vm7, %v44_v22  }
  0x82   :  { %52 = vst.msk [vmem:[#allocation0] sm:$0x1] %vm51_vm8, %v50_v23  }
  0x84   :  { %v56_v24 = vpop.permute.xlu0 %55   ;;  %v62_v25 = vpop.permute.xlu1 %61  }
  0x85   :  { %58 = vst.msk [vmem:[#allocation0] sm:$0x1] %vm57_vm9, %v56_v24  }
  0x86   :  { %64 = vst.msk [vmem:[#allocation0] sm:$0x1] %vm63_vm10, %v62_v25  }
  0x88   :  { %v68_v26 = vpop.permute.xlu0 %67   ;;  %v74_v27 = vpop.permute.xlu1 %73  }
  0x89   :  { %70 = vst.msk [vmem:[#allocation0] sm:$0x1] %vm69_vm11, %v68_v26  }
  0x8a   :  { %76 = vst.msk [vmem:[#allocation0] sm:$0x1] %vm75_vm12, %v74_v27  }
  0x8c   :  { %v80_v28 = vpop.permute.xlu0 %79   ;;  %v86_v29 = vpop.permute.xlu1 %85  }
  0x8d   :  { %82 = vst.msk [vmem:[#allocation0] sm:$0x1] %vm81_vm13, %v80_v28  }
  0x8e   :  { %88 = vst.msk [vmem:[#allocation0] sm:$0x1] %vm87_vm14, %v86_v29  }
  0x90   :  { %v92_v30 = vpop.permute.xlu0 %91  }
  0x91   :  { %94 = vst.msk [vmem:[#allocation0] sm:$0x1] %vm93_vm15, %v92_v30  }
  0x98   :  { %v98_v31 = vld [vmem:[#allocation0] sm:$0x1] }
  0x99   :  { %100 = vst [vmem:[%s208_s1] sm:$0x1] %v98_v31 }

// kernel: resblock_forward.5
= control target key start
LH: loop header
LB: loop body
LE: loop exit
PB: predicated region body
PF: predicated region fallthrough
CT: control target
= control target key end

     0   :  { %s318_s12 = smov 0   ;;  %s335_s0 = inlined_call_operand.vmem [shape: f32[2,16,128], index: 0, kind: input, shape index: {}]   ;;  %s336_s1 = inlined_call_operand.vmem [shape: f32[1,128], index: 1, kind: input, shape index: {}]   ;;  %s337_s2 = inlined_call_operand.vmem [shape: f32[1,128], index: 2, kind: input, shape index: {}]   ;;  %s338_s3 = inlined_call_operand.vmem [shape: bf16[2,16,128], index: 3, kind: output, shape index: {}]  }
   0x1 LB: > { %s258_s13 = sadd.s32 4294967295, %s296_s12   ;;  %p262_p0 = scmp.ge.s32.totalorder %s296_s12, 1  ;;  %s296_s12 = sphi %s318_s12, %s13_s12  }
   0x2   : > { %p137_p1 = scmp.lt.s32.totalorder %s296_s12, 3 }
   0x4   : > { %p138_p2 = pnand %p262_p0, %p137_p1 }
   0x5   : > { %p161_p3 = scmp.lt.s32.totalorder (!%p138_p2), %s258_s13, 1  ;;  %v267_v0 = vld [vmem:[%s336_s1] ss:$0 sm:$0xff] (!%p138_p2) }
   0x6   : > { %141 = sbr.rel (%p138_p2) target bundleno = 26 (0x1a), region = 32  ;;  %v268_v3 = vld [vmem:[%s337_s2] ss:$0 sm:$0xff] (!%p138_p2) }
   0xd   : > { %s340_s13 = smov (!%p161_p3, %s258_s13), 1 }
   0xe   : > { %s273_s14 = sshll.u32 %s340_s13, 4  ;;  %s274_s22 = sshll.u32 %s340_s13, 3 }
   0xf   : > { %s165_s19 = scalar_lea.vmem %s335_s0, %s273_s14  ;;  %s170_s25 = scalar_lea.vmem %s338_s3, %s274_s22 }
  0x10   : > { %v171_v1 = vld [vmem:[%s165_s19] sm:$0xff]  ;;  %v172_v2 = vld [vmem:[%s165_s19 + $0x8] sm:$0xff] }
  0x11   : > { %v180_v4 = vmul.f32 %v267_v0, %v171_v1  ;;  %v181_v5 = vmul.f32 %v267_v0, %v172_v2 }
  0x13   : > { %v189_v6 = vadd.f32 %v268_v3, %v180_v4  ;;  %v190_v7 = vadd.f32 %v268_v3, %v181_v5 }
  0x15   : > { %v191_v8 = vmax.f32 %v189_v6, 0.0  ;;  %v192_v9 = vmax.f32 %v190_v7, 0.0 }
  0x17   : > { %v280_v10 = vpack.c.bf16 %v192_v9, %v191_v8 }
  0x19   : > { %281 = vst [vmem:[%s170_s25] sm:$0xff] %v280_v10  }
  0x1a PF: > { %s13_s12 = sadd.s32 1, %s296_s12  }
  0x1b   : > { %p10_p4 = scmp.ge.s32.totalorder %s13_s12, 4  }
  0x1d   :  { %12 = sbr.rel (!%p10_p4) target bundleno = 1 (0x1), region = 62 }

// kernel: resblock_forward.7
= control target key start
LH: loop header
LB: loop body
LE: loop exit
PB: predicated region body
PF: predicated region fallthrough
CT: control target
= control target key end

     0   :  { %s372_s15 = smov 0   ;;  %s398_s0 = inlined_call_operand.vmem [shape: f32[2,16,128], index: 0, kind: input, shape index: {}]   ;;  %s399_s1 = inlined_call_operand.vmem [shape: f32[1,128], index: 1, kind: input, shape index: {}]   ;;  %s400_s2 = inlined_call_operand.vmem [shape: f32[1,128], index: 2, kind: input, shape index: {}]   ;;  %s401_s3 = inlined_call_operand.vmem [shape: f32[2,16,128], index: 3, kind: input, shape index: {}]   ;;  %s402_s4 = inlined_call_operand.vmem [shape: f32[2,16,128], index: 4, kind: output, shape index: {}]  }
   0x1 LB: > { %s313_s16 = sadd.s32 4294967295, %s345_s15   ;;  %p317_p0 = scmp.ge.s32.totalorder %s345_s15, 1  ;;  %s345_s15 = sphi %s372_s15, %s14_s15  }
   0x2   : > { %p172_p1 = scmp.lt.s32.totalorder %s345_s15, 3 }
   0x4   : > { %p173_p2 = pnand %p317_p0, %p172_p1 }
   0x5   : > { %p203_p3 = scmp.lt.s32.totalorder (!%p173_p2), %s313_s16, 1  ;;  %v324_v0 = vld [vmem:[%s399_s1] ss:$0 sm:$0xff] (!%p173_p2) }
   0x6   : > { %176 = sbr.rel (%p173_p2) target bundleno = 26 (0x1a), region = 36  ;;  %v325_v3 = vld [vmem:[%s400_s2] ss:$0 sm:$0xff] (!%p173_p2) }
   0xd   : > { %s404_s16 = smov (!%p203_p3, %s313_s16), 1 }
   0xe   : > { %s328_s17 = sshll.u32 %s404_s16, 4 }
   0xf   : > { %s207_s22 = scalar_lea.vmem %s398_s0, %s328_s17  ;;  %s212_s27 = scalar_lea.vmem %s401_s3, %s328_s17 }
  0x10   : > { %v218_v1 = vld [vmem:[%s207_s22] sm:$0xff]  ;;  %v219_v2 = vld [vmem:[%s207_s22 + $0x8] sm:$0xff]  ;;  %s217_s30 = scalar_lea.vmem %s402_s4, %s328_s17 }
  0x11   : > { %v227_v4 = vmul.f32 %v324_v0, %v218_v1  ;;  %v228_v5 = vmul.f32 %v324_v0, %v219_v2  ;;  %v240_v8 = vld [vmem:[%s212_s27] sm:$0xff]  ;;  %v241_v9 = vld [vmem:[%s212_s27 + $0x8] sm:$0xff] }
  0x13   : > { %v236_v6 = vadd.f32 %v325_v3, %v227_v4  ;;  %v237_v7 = vadd.f32 %v325_v3, %v228_v5 }
  0x15   : > { %v238_v10 = vmax.f32 %v236_v6, 0.0  ;;  %v239_v11 = vmax.f32 %v237_v7, 0.0 }
  0x17   : > { %v242_v12 = vadd.f32 %v240_v8, %v238_v10  ;;  %v243_v13 = vadd.f32 %v241_v9, %v239_v11 }
  0x19   : > { %244 = vst [vmem:[%s217_s30] sm:$0xff] %v242_v12  ;;  %245 = vst [vmem:[%s217_s30 + $0x8] sm:$0xff] %v243_v13 }
  0x1a PF: > { %s14_s15 = sadd.s32 1, %s345_s15  }
  0x1b   : > { %p11_p4 = scmp.ge.s32.totalorder %s14_s15, 4  }
  0x1d   :  { %13 = sbr.rel (!%p11_p4) target bundleno = 1 (0x1), region = 69 }

</bundles_post_ra>
